<compile_context>
chip_gen: v7x
topology: tpu7x:2x2x1
jax: 0.10.0
libtpu: 0.0.40
codegen_flags: <defaults>
</compile_context>

<pallas_src>
import jax
import jax.numpy as jnp
from jax.experimental import pallas as pl
from jax.experimental.pallas import tpu as pltpu


def _generator_kernel(x_ref, w1_ref, b1_ref, w2_ref, b2_ref, o_ref):
    """Fused Linear -> ReLU -> Linear on one (possibly lane-packed) batch tile.

    Packed production shapes (pack=4, D=32, H=128):
      x:  (TBp, 128)   w1: (128, 512)   b1: (1, 512)
      w2: (512, 128)   b2: (1, 128)     out: (TBp, 128)

    MXU operand dtype is set by the wrapper via the weight dtype (f32 or bf16);
    accumulation, bias-add and ReLU are always f32.
    """
    xv = x_ref[...].astype(w1_ref.dtype)        # in-kernel cast: no extra HBM pass
    h = jnp.dot(xv, w1_ref[...], preferred_element_type=jnp.float32)
    h = jnp.maximum(h + b1_ref[...], 0.0)       # bias + ReLU in f32 (VPU)
    h = h.astype(w2_ref.dtype)                  # operand dtype for 2nd MXU pass
    y = jnp.dot(h, w2_ref[...], preferred_element_type=jnp.float32)
    o_ref[...] = (y + b2_ref[...]).astype(o_ref.dtype)


def generator_forward(noise, w1, b1, w2, b2, *, batch_tile=None,
                      use_bf16_matmul=False):
    """Fused 2-layer MLP (Linear -> ReLU -> Linear) as a Pallas TPU kernel.

    noise: (B, D)          w1: (D, H)   b1: (1, H)
    w2:    (H, D)          b2: (1, D)        -> returns (B, D) in noise.dtype

    batch_tile=None  -> gridless single-VMEM-block kernel (tiny batches).
                        TODO(synk): for tiny B prefer fusing into the consumer.
    batch_tile=TB    -> production path: lane-dense packing (pack=128//D rows
                        per 128-lane row, block-diagonal weights), grid of
                        cdiv(B, TB) "parallel" steps over the batch, weights
                        VMEM-resident across the grid, no pad/slice.
    use_bf16_matmul  -> bf16 MXU operands (weights cast in wrapper, x cast
                        in-kernel), f32 accumulate / bias / ReLU.
    """
    B, D = noise.shape
    H = w1.shape[1]
    assert w1.shape == (D, H)
    assert b1.shape == (1, H)
    assert w2.shape == (H, D)
    assert b2.shape == (1, D)

    out_dtype = noise.dtype
    b1 = b1.astype(jnp.float32)
    b2 = b2.astype(jnp.float32)
    w_dtype = jnp.bfloat16 if use_bf16_matmul else w1.dtype

    if batch_tile is None:
        # Tiny-batch path: no grid, no pipelining machinery — everything is a
        # single full block resident in VMEM for the one kernel invocation.
        return pl.pallas_call(
            _generator_kernel,
            out_shape=jax.ShapeDtypeStruct((B, D), out_dtype),
            in_specs=[pl.BlockSpec(memory_space=pltpu.MemorySpace.VMEM)] * 5,
            out_specs=pl.BlockSpec(memory_space=pltpu.MemorySpace.VMEM),
        )(noise, w1.astype(w_dtype), b1, w2.astype(w_dtype), b2)

    # ---------------- Production path: lane-dense packing + batch grid -----
    # Pack `pack` rows of width D into one 128-lane row (row-major reshape,
    # contiguous -> free) and make the weights block-diagonal so a single pair
    # of matmuls per tile computes `pack` independent rows at once.
    pack = 128 // D if (D < 128 and 128 % D == 0 and B % (128 // D) == 0) else 1
    Dp, Hp = pack * D, pack * H
    if pack > 1:
        eye_p = jnp.eye(pack, dtype=w1.dtype)
        w1 = jnp.kron(eye_p, w1)            # (Dp, Hp) block-diagonal
        w2 = jnp.kron(eye_p, w2)            # (Hp, Dp) block-diagonal
        b1 = jnp.tile(b1, (1, pack))        # (1, Hp)
        b2 = jnp.tile(b2, (1, pack))        # (1, Dp)
        x = noise.reshape(B // pack, Dp)    # lane-dense input slab
    else:
        x = noise
    rows = B // pack

    tb = int(batch_tile)
    assert tb % pack == 0, "batch_tile must be a multiple of the lane-pack factor"
    tbp = tb // pack                        # packed rows per tile
    sublane = 16 if x.dtype == jnp.bfloat16 else 8
    assert tbp % sublane == 0, (
        f"batch_tile // {pack} must be a multiple of {sublane} for {x.dtype}")

    grid = (pl.cdiv(rows, tbp),)            # ragged last block masked by Pallas

    out_packed = pl.pallas_call(
        _generator_kernel,
        out_shape=jax.ShapeDtypeStruct((rows, Dp), out_dtype),
        grid=grid,
        in_specs=[
            pl.BlockSpec((tbp, Dp), lambda i: (i, 0)),   # x: streamed per tile
            pl.BlockSpec((Dp, Hp), lambda i: (0, 0)),    # w1: VMEM-resident
            pl.BlockSpec((1, Hp), lambda i: (0, 0)),     # b1: resident
            pl.BlockSpec((Hp, Dp), lambda i: (0, 0)),    # w2: resident
            pl.BlockSpec((1, Dp), lambda i: (0, 0)),     # b2: resident
        ],
        out_specs=pl.BlockSpec((tbp, Dp), lambda i: (i, 0)),
        compiler_params=pltpu.CompilerParams(
            dimension_semantics=("parallel",),   # v7x: 2 TCs split the batch grid
        ),
    )(x, w1.astype(w_dtype), b1, w2.astype(w_dtype), b2)

    return out_packed.reshape(B, D)


def generator_reference(noise, w1, b1, w2, b2):
    """Pure-JAX f32 reference matching the PyTorch forward exactly."""
    h = jnp.maximum(noise @ w1 + b1, 0.0)
    return h @ w2 + b2


if __name__ == "__main__":
    # Shapes consistent with the module: (batch, embedding_dim) ->
    # (batch, embedding_dim) with hidden width 128.
    batch = 8
    embedding_dim = 32    # stand-in for entity_embeddings.shape[1]
    hidden = 128

    key = jax.random.PRNGKey(0)
    k_noise, k_w1, k_b1, k_w2, k_b2 = jax.random.split(key, 5)

    # Deterministic synthetic parameters (no checkpoint load).  Mimic PyTorch
    # nn.Linear default init: U(-1/sqrt(fan_in), 1/sqrt(fan_in)).
    bound1 = 1.0 / jnp.sqrt(embedding_dim)
    bound2 = 1.0 / jnp.sqrt(hidden)
    w1 = jax.random.uniform(k_w1, (embedding_dim, hidden),
                            minval=-bound1, maxval=bound1, dtype=jnp.float32)
    b1 = jax.random.uniform(k_b1, (1, hidden),
                            minval=-bound1, maxval=bound1, dtype=jnp.float32)
    w2 = jax.random.uniform(k_w2, (hidden, embedding_dim),
                            minval=-bound2, maxval=bound2, dtype=jnp.float32)
    b2 = jax.random.uniform(k_b2, (1, embedding_dim),
                            minval=-bound2, maxval=bound2, dtype=jnp.float32)

    noise = jax.random.normal(k_noise, (batch, embedding_dim), dtype=jnp.float32)

    # 1) Tiny-batch path: gridless, single VMEM block, exact f32.
    out = jax.block_until_ready(generator_forward(noise, w1, b1, w2, b2))
    ref = generator_reference(noise, w1, b1, w2, b2)
    assert out.shape == (batch, embedding_dim)
    assert jnp.allclose(out, ref, atol=1e-5, rtol=1e-5), "small-path mismatch"

    # 2) Production path: lane-dense pack=4 (packed (512,128) f32 tiles),
    #    batch_tile=2048 -> grid of 4 "parallel" steps (even 2-TC split on
    #    v7x, 2 pipelined steps per core), weights VMEM-resident, exact f32.
    big_batch = 8192
    noise_big = jax.random.normal(jax.random.PRNGKey(1),
                                  (big_batch, embedding_dim), dtype=jnp.float32)
    out_big = jax.block_until_ready(
        generator_forward(noise_big, w1, b1, w2, b2, batch_tile=2048))
    ref_big = generator_reference(noise_big, w1, b1, w2, b2)
    assert out_big.shape == (big_batch, embedding_dim)
    assert jnp.allclose(out_big, ref_big, atol=1e-5, rtol=1e-5), "tiled-path mismatch"

    # 3) Ragged grid (no pad / slice HBM round trip): B=1000, batch_tile=512
    #    -> packed rows=250, grid=cdiv(250,128)=2; Pallas drops OOB writes of
    #    the partial last block (rows are independent, no contamination).
    ragged_batch = 1000
    noise_rag = jax.random.normal(jax.random.PRNGKey(2),
                                  (ragged_batch, embedding_dim), dtype=jnp.float32)
    out_rag = jax.block_until_ready(
        generator_forward(noise_rag, w1, b1, w2, b2, batch_tile=512))
    ref_rag = generator_reference(noise_rag, w1, b1, w2, b2)
    assert out_rag.shape == (ragged_batch, embedding_dim)
    assert jnp.allclose(out_rag, ref_rag, atol=1e-5, rtol=1e-5), "ragged-path mismatch"

    # 4) bf16 MXU operands: weights cast (tiny) in the wrapper, x cast
    #    in-kernel (no extra HBM pass), f32 accumulate / bias / ReLU.
    out_bf16 = jax.block_until_ready(
        generator_forward(noise_big, w1, b1, w2, b2,
                          batch_tile=2048, use_bf16_matmul=True))
    assert jnp.allclose(out_bf16, ref_big, atol=5e-2, rtol=5e-2), "bf16-path mismatch"

    print("KERNEL_OK")
</pallas_src>

<mosaic_0001>
module attributes {stable_mosaic.version = 11 : i64} {
  func.func @_generator_kernel(%arg0: memref<8x32xf32, #tpu.memory_space<vmem>>, %arg1: memref<32x128xf32, #tpu.memory_space<vmem>>, %arg2: memref<1x128xf32, #tpu.memory_space<vmem>>, %arg3: memref<128x32xf32, #tpu.memory_space<vmem>>, %arg4: memref<1x32xf32, #tpu.memory_space<vmem>>, %arg5: memref<8x32xf32, #tpu.memory_space<vmem>>) attributes {dimension_semantics = [], scalar_prefetch = 0 : i64, scratch_operands = 0 : i64, tpu.core_type = #tpu.core_type<tc>} {
    %c0 = arith.constant 0 : index
    %c0_0 = arith.constant 0 : index
    %0 = vector.load %arg0[%c0, %c0_0] : memref<8x32xf32, #tpu.memory_space<vmem>>, vector<8x32xf32>
    %c0_1 = arith.constant 0 : index
    %c0_2 = arith.constant 0 : index
    %1 = vector.load %arg1[%c0_1, %c0_2] : memref<32x128xf32, #tpu.memory_space<vmem>>, vector<32x128xf32>
    %cst = arith.constant dense<0.000000e+00> : vector<8x128xf32>
    %2 = tpu.matmul %0, %1, %cst {dimension_numbers = #tpu.dot_dimension_numbers<[1], [0], [0], [1], [0, 0, 1, 1], [], []>} : vector<8x32xf32>, vector<32x128xf32>, vector<8x128xf32> -> vector<8x128xf32>
    %c0_3 = arith.constant 0 : index
    %c0_4 = arith.constant 0 : index
    %3 = vector.load %arg2[%c0_3, %c0_4] : memref<1x128xf32, #tpu.memory_space<vmem>>, vector<1x128xf32>
    %4 = vector.broadcast %3 : vector<1x128xf32> to vector<8x128xf32>
    %5 = arith.addf %2, %4 : vector<8x128xf32>
    %cst_5 = arith.constant 0.000000e+00 : f32
    %6 = vector.broadcast %cst_5 : f32 to vector<8x128xf32>
    %7 = arith.maximumf %5, %6 : vector<8x128xf32>
    %c0_6 = arith.constant 0 : index
    %c0_7 = arith.constant 0 : index
    %8 = vector.load %arg3[%c0_6, %c0_7] : memref<128x32xf32, #tpu.memory_space<vmem>>, vector<128x32xf32>
    %cst_8 = arith.constant dense<0.000000e+00> : vector<8x32xf32>
    %9 = tpu.matmul %7, %8, %cst_8 {dimension_numbers = #tpu.dot_dimension_numbers<[1], [0], [0], [1], [0, 0, 1, 1], [], []>} : vector<8x128xf32>, vector<128x32xf32>, vector<8x32xf32> -> vector<8x32xf32>
    %c0_9 = arith.constant 0 : index
    %c0_10 = arith.constant 0 : index
    %10 = vector.load %arg4[%c0_9, %c0_10] : memref<1x32xf32, #tpu.memory_space<vmem>>, vector<1x32xf32>
    %11 = vector.broadcast %10 : vector<1x32xf32> to vector<8x32xf32>
    %12 = arith.addf %9, %11 : vector<8x32xf32>
    %c0_11 = arith.constant 0 : index
    %c0_12 = arith.constant 0 : index
    %13 = vector.load %arg5[%c0_11, %c0_12] : memref<8x32xf32, #tpu.memory_space<vmem>>, vector<8x32xf32>
    tpu.vector_store %arg5[%c0_11, %c0_12], %12 {strides = array<i32>} : memref<8x32xf32, #tpu.memory_space<vmem>>, vector<8x32xf32>,
    return
  }
}

</mosaic_0001>

<bundles_post_ra>
// kernel: tpu_custom_call.1
= control target key start
LH: loop header
LB: loop body
LE: loop exit
PB: predicated region body
PF: predicated region fallthrough
CT: control target
= control target key end

     0   :  { %v345_v3 = vmov 0.0|0.0   ;;  %vm346_vm0 = vmmov 0   ;;  %v347_v6 = vmov 0.0   ;;  %s462_s0 = inlined_call_operand.vmem [shape: f32[8,32], index: 0, kind: input, shape index: {}]   ;;  %s463_s1 = inlined_call_operand.vmem [shape: f32[32,128], index: 1, kind: input, shape index: {}]   ;;  %s464_s2 = inlined_call_operand.vmem [shape: f32[1,128], index: 2, kind: input, shape index: {}]   ;;  %s465_s3 = inlined_call_operand.vmem [shape: f32[128,32], index: 3, kind: input, shape index: {}]   ;;  %s466_s4 = inlined_call_operand.vmem [shape: f32[1,32], index: 4, kind: input, shape index: {}]   ;;  %s467_s5 = inlined_call_operand.hbm [shape: f32[8,32], index: 5, kind: output, shape index: {}]  }
   0x1   :  { %v22_v0 = vld [vmem:[%s463_s1] sm:$0xff]  ;;  %v23_v1 = vld [vmem:[%s463_s1 + $0x8] sm:$0xff]  ;;  %v24_v2 = vld [vmem:[%s463_s1 + $0x10] sm:$0xff]  ;;  %287 = vmatprep.subr.bf16.mxu0 %v345_v3  ;;  %249 = vmatprep.mubr.msk.f32.mxu0 %vm346_vm0, %v347_v6 }
   0x2   :  { %v288_v4 = vpack.c.bf16 %v23_v1, %v22_v0  ;;  %v25_v5 = vld [vmem:[%s463_s1 + $0x18] sm:$0xff]  ;;  %v108_v7 = vld [vmem:[%s465_s3] sm:$0xff]  ;;  %293 = vmatprep.subr.bf16.mxu1 %v345_v3  ;;  %v109_v8 = vld [vmem:[%s465_s3 + $0x8] sm:$0xff]  ;;  %284 = vmatprep.mubr.msk.f32.mxu1 %vm346_vm0, %v347_v6 }
   0x3   :  { %v110_v9 = vld [vmem:[%s465_s3 + $0x10] sm:$0xff]  ;;  %v111_v10 = vld [vmem:[%s465_s3 + $0x18] sm:$0xff]  ;;  %v291_v11 = vpack.c.bf16 %v25_v5, %v24_v2  ;;  %v294_v12 = vpack.c.bf16 %v109_v8, %v108_v7  ;;  %v112_v14 = vld [vmem:[%s465_s3 + $0x20] sm:$0xff] }
   0x4   :  { %289 = vmatpush3.bf16.msra.mxu0 %v288_v4  ;;  %v297_v13 = vpack.c.bf16 %v111_v10, %v110_v9  ;;  %v113_v15 = vld [vmem:[%s465_s3 + $0x28] sm:$0xff] }
   0x5   :  { %290 = vmatprep.subr.bf16.mxu0 %v345_v3  ;;  %295 = vmatpush3.bf16.msra.mxu1 %v294_v12 }
   0x6   :  { %296 = vmatprep.subr.bf16.mxu1 %v345_v3 }
   0x7   :  { %10 = vsyncpa [#allocation3], 0  ;;  %v21_v16 = vld [vmem:[%s462_s0] sm:$0xff]  ;;  %vm33_vm1 = vcmask 261120   ;;  %v300_v17 = vpack.c.bf16 %v113_v15, %v112_v14  ;;  %v114_v18 = vld [vmem:[%s465_s3 + $0x30] sm:$0xff]  ;;  %s348_s11 = smov [#allocation2]  }
   0x8   :  { %292 = vmatpush3.bf16.msra.mxu0 %v291_v11  ;;  %v115_v19 = vld [vmem:[%s465_s3 + $0x38] sm:$0xff]  ;;  %v116_v21 = vld [vmem:[%s465_s3 + $0x40] sm:$0xff]  ;;  %v117_v22 = vld [vmem:[%s465_s3 + $0x48] sm:$0xff]  ;;  %s208_s12 = sshll.u32 %s348_s11, 4  ;;  %s209_s12 = int_to_ptr.vmem [resolvable:$true] %s208_s12 }
   0x9   :  { %298 = vmatpush3.bf16.msra.mxu1 %v297_v13  ;;  %v303_v20 = vpack.c.bf16 %v115_v19, %v114_v18  ;;  %v306_v23 = vpack.c.bf16 %v117_v22, %v116_v21  ;;  %v118_v24 = vld [vmem:[%s465_s3 + $0x50] sm:$0xff]  ;;  %v119_v25 = vld [vmem:[%s465_s3 + $0x58] sm:$0xff]  ;;  %v120_v27 = vld [vmem:[%s465_s3 + $0x60] sm:$0xff]  ;;  %p326_p1 = scmp.lt.s32.totalorder %s209_s12, %s209_s12 }
   0xa   :  { %299 = vmatprep.subr.bf16.mxu1 %v345_v3  ;;  %v309_v26 = vpack.c.bf16 %v119_v25, %v118_v24  ;;  %v121_v28 = vld [vmem:[%s465_s3 + $0x68] sm:$0xff]  ;;  %v122_v30 = vld [vmem:[%s465_s3 + $0x70] sm:$0xff]  ;;  %v123_v31 = vld [vmem:[%s465_s3 + $0x78] sm:$0xff]  ;;  %s321_s3 = scalar_lea.vmem %s209_s12, 128 }
   0xb   :  { %250 = vmatmul.mubr.msk.f32.vlgmr.msra.gmra.mrb[0].mxu0 %vm33_vm1, %v21_v16  ;;  %v312_v29 = vpack.c.bf16 %v121_v28, %v120_v27  ;;  %v315_v32 = vpack.c.bf16 %v123_v31, %v122_v30  ;;  %v216_v33 = vld [vmem:[%s464_s2] ss:$0 sm:$0xff]  ;;  %p322_p0 = scmp.ne.s32.totalorder %s209_s12, %s321_s3  ;;  %p327_p2 = scmp.lt.s32.totalorder %s321_s3, %s321_s3 }
   0xc   :  { %v218_v38 = vld [vmem:[%s466_s4] ss:$0 sm:$0xff] }
   0xd   :  { %301 = vmatpush3.bf16.msra.mxu1 %v300_v17  ;;  %p328_p3 = por %p327_p2, %p326_p1 }
   0xe   :  { %302 = vmatprep.subr.bf16.mxu1 %v345_v3 }
   0xf   :  { %p329_p4 = pnand %p328_p3, %p322_p0 }
  0x11   :  { %304 = vmatpush3.bf16.msra.mxu1 %v303_v20 }
  0x12   :  { %305 = vmatprep.subr.bf16.mxu1 %v345_v3 }
  0x15   :  { %307 = vmatpush3.bf16.msra.mxu1 %v306_v23 }
  0x16   :  { %308 = vmatprep.subr.bf16.mxu1 %v345_v3 }
  0x19   :  { %310 = vmatpush3.bf16.msra.mxu1 %v309_v26 }
  0x1a   :  { %311 = vmatprep.subr.bf16.mxu1 %v345_v3 }
  0x1d   :  { %313 = vmatpush3.bf16.msra.mxu1 %v312_v29 }
  0x1e   :  { %314 = vmatprep.subr.bf16.mxu1 %v345_v3 }
  0x21   :  { %316 = vmatpush3.bf16.msra.mxu1 %v315_v32 }
  0xde   :  { %v103_v34 = vpop.f32.mrb[0].mxu0 }
  0xdf   :  { %v104_v35 = vadd.f32 %v216_v33, %v103_v34  ;;  %v251_v36 = vpop.f32.mrb[1].mxu0 }
  0xe1   :  { %v107_v37 = vmax.f32 %v104_v35, 0.0 }
  0xe3   :  { %285 = vmatmul.mubr.f32.vlgmr.msra.gmra.mrb[0].mxu1 %v107_v37 }
 0x1b6   :  { %v197_v39 = vpop.f32.mrb[0].mxu1 }
 0x1b7   :  { %v198_v40 = vadd.f32 %v218_v38, %v197_v39  ;;  %v286_v41 = vpop.f32.mrb[1].mxu1 }
 0x1b9   :  { %201 = vst.msk [vmem:[#allocation2] sm:$0xff] %vm33_vm1, %v198_v40 }
 0x1ba   :  { %332 = shalt.err (!%p329_p4)
}
 0x1bb   :  { %s333_s14 = scalar_lea.hbm %s467_s5, 128 }
 0x1bc   :  { %p334_p5 = scmp.ne.s32.totalorder %s467_s5, %s333_s14  ;;  %p337_p6 = scmp.lt.u32.totalorder %s333_s14, %s467_s5 }
 0x1be   :  { %p339_p7 = pnand %p337_p6, %p334_p5 }
 0x1c0   :  { %342 = shalt.err (!%p339_p7)
}
 0x1c1   :  { %211 = dma.vmem_to_hbm [thread:$0]  %s209_s12, 128, %s467_s5, [#allocation3]  }
 0x1c2   :  { %343 = dma.done.wait [#allocation3], 128  }
 0x1c3   :  { %344 = vsyncadd [#allocation3], 4294967168 }
 0x1c4   :  { %215 = vsyncpa [#allocation3], 1 }

</bundles_post_ra>
